<compile_context>
chip_gen: v7x
topology: tpu7x:2x2x1
jax: 0.10.0
libtpu: 0.0.40
codegen_flags: <defaults>
</compile_context>

<pallas_src>
import functools

import jax
import jax.numpy as jnp
from jax import lax
from jax.experimental import pallas as pl
from jax.experimental.pallas import tpu as pltpu

NEG_INF = float(jnp.finfo(jnp.float32).min)


def _tile(dim, target, align):
    """Largest divisor of `dim` that is a multiple of `align` and <= target,
    falling back to the full dim (keeps BlockSpec (8,128)-legal)."""
    if dim <= target:
        return dim
    t = (min(target, dim) // align) * align
    while t >= align:
        if dim % t == 0:
            return t
        t -= align
    return dim


# ----------------------- LayerNorm + matmul (+epilogue) ----------------------

def _ln_matmul_kernel(x_ref, g_ref, bln_ref, w_ref, *rest, eps, has_bias,
                      scale, activation, rhs_contract_last):
    if has_bias:
        b_ref, o_ref = rest
    else:
        (o_ref,) = rest

    # LayerNorm on the VMEM-resident x tile (f32 statistics).
    x = x_ref[...].astype(jnp.float32)
    mean = jnp.mean(x, axis=-1, keepdims=True)
    xc = x - mean
    var = jnp.mean(xc * xc, axis=-1, keepdims=True)
    h = xc * lax.rsqrt(var + eps) * g_ref[...] + bln_ref[...]
    h = h.astype(x_ref.dtype)

    if rhs_contract_last:
        # rhs stored as (N, K); contract on K of both -> avoids transposing rhs.
        acc = lax.dot_general(h, w_ref[...], (((1,), (1,)), ((), ())),
                              preferred_element_type=jnp.float32)
    else:
        acc = jnp.dot(h, w_ref[...], preferred_element_type=jnp.float32)

    if has_bias:
        acc = acc + b_ref[...].astype(jnp.float32)
    if scale is not None:
        acc = acc * scale
    if activation == "gelu":
        # exact erf GELU (matches torch.nn.GELU default); erf runs on the EUP.
        acc = 0.5 * acc * (1.0 + lax.erf(acc * (2.0 ** -0.5)))
    o_ref[...] = acc.astype(o_ref.dtype)


def ln_matmul(x, gamma, beta, w, b=None, *, scale=None, activation=None,
              rhs_contract_last=False, eps=1e-5, tm_target=256, tn_target=512):
    """out = epilogue(LayerNorm(x) @ W + b).  x:(M,K); W:(K,N) or (N,K)."""
    M, K = x.shape
    N = w.shape[0] if rhs_contract_last else w.shape[1]
    tm = _tile(M, tm_target, 8)
    tn = _tile(N, tn_target, 128)
    has_bias = b is not None

    in_specs = [
        pl.BlockSpec((tm, K), lambda i, j: (i, 0)),
        pl.BlockSpec((1, K), lambda i, j: (0, 0)),
        pl.BlockSpec((1, K), lambda i, j: (0, 0)),
    ]
    if rhs_contract_last:
        in_specs.append(pl.BlockSpec((tn, K), lambda i, j: (j, 0)))
    else:
        in_specs.append(pl.BlockSpec((K, tn), lambda i, j: (0, j)))
    args = [x, gamma.reshape(1, K), beta.reshape(1, K), w]
    if has_bias:
        in_specs.append(pl.BlockSpec((1, tn), lambda i, j: (0, j)))
        args.append(b.reshape(1, N))

    kernel = functools.partial(
        _ln_matmul_kernel, eps=eps, has_bias=has_bias, scale=scale,
        activation=activation, rhs_contract_last=rhs_contract_last)
    return pl.pallas_call(
        kernel,
        out_shape=jax.ShapeDtypeStruct((M, N), x.dtype),
        grid=(M // tm, N // tn),
        in_specs=in_specs,
        out_specs=pl.BlockSpec((tm, tn), lambda i, j: (i, j)),
        compiler_params=pltpu.CompilerParams(
            dimension_semantics=("parallel", "parallel")),
    )(*args)


# ------------------- matmul + bias + residual (K-tiled) ----------------------

def _matmul_res_kernel(x_ref, w_ref, b_ref, r_ref, o_ref, acc_ref):
    @pl.when(pl.program_id(2) == 0)
    def _():
        acc_ref[...] = jnp.zeros_like(acc_ref)

    acc_ref[...] += jnp.dot(x_ref[...], w_ref[...],
                            preferred_element_type=jnp.float32)

    @pl.when(pl.program_id(2) == pl.num_programs(2) - 1)
    def _():
        out = (acc_ref[...] + b_ref[...].astype(jnp.float32)
               + r_ref[...].astype(jnp.float32))
        o_ref[...] = out.astype(o_ref.dtype)


def matmul_bias_residual(x, w, b, residual, *, tm_target=256, tn_target=512,
                         tk_target=512):
    """out = x @ W + b + residual, with tiled K accumulation."""
    M, K = x.shape
    N = w.shape[1]
    tm = _tile(M, tm_target, 8)
    tn = _tile(N, tn_target, 128)
    tk = _tile(K, tk_target, 128)
    return pl.pallas_call(
        _matmul_res_kernel,
        out_shape=jax.ShapeDtypeStruct((M, N), x.dtype),
        grid=(M // tm, N // tn, K // tk),
        in_specs=[
            pl.BlockSpec((tm, tk), lambda i, j, k: (i, k)),
            pl.BlockSpec((tk, tn), lambda i, j, k: (k, j)),
            pl.BlockSpec((1, tn), lambda i, j, k: (0, j)),
            pl.BlockSpec((tm, tn), lambda i, j, k: (i, j)),
        ],
        out_specs=pl.BlockSpec((tm, tn), lambda i, j, k: (i, j)),
        scratch_shapes=[pltpu.VMEM((tm, tn), jnp.float32)],
        compiler_params=pltpu.CompilerParams(
            dimension_semantics=("parallel", "parallel", "arbitrary")),
    )(x, w, b.reshape(1, N), residual)


# --------------------------------- attention ---------------------------------

def _attention_kernel(*refs, num_heads, head_dim, causal, past_len,
                      has_kv_mask):
    if has_kv_mask:
        q_ref, k_ref, v_ref, m_ref, o_ref = refs
    else:
        q_ref, k_ref, v_ref, o_ref = refs
    T = q_ref.shape[1]
    KV = k_ref.shape[2]

    # Additive mask (built from registers, never DMA'd as a (B,1,T,KV) tensor).
    bias = None
    if has_kv_mask:
        m = m_ref[0].astype(jnp.float32)                       # (1, KV)
        bias = jnp.where(m == 1.0, 0.0, NEG_INF).astype(jnp.float32)
    if causal:
        rows = lax.broadcasted_iota(jnp.int32, (T, KV), 0)
        cols = lax.broadcasted_iota(jnp.int32, (T, KV), 1)
        cb = jnp.where(cols <= rows + past_len, 0.0, NEG_INF).astype(jnp.float32)
        bias = cb if bias is None else bias + cb

    # TODO(synk): per-head Dh (<128) VMEM slices are lane-masked; a further
    # head-packed score layout could raise MXU/lane utilization.
    for h in range(num_heads):
        q = q_ref[0, :, h * head_dim:(h + 1) * head_dim]       # (T, Dh)
        k = k_ref[0, h]                                        # (KV, Dh)
        v = v_ref[0, h]
        s = lax.dot_general(q, k, (((1,), (1,)), ((), ())),
                            preferred_element_type=jnp.float32)  # (T, KV)
        if bias is not None:
            s = s + bias
        s = s - jnp.max(s, axis=-1, keepdims=True)
        p = jnp.exp(s)
        denom = jnp.sum(p, axis=-1, keepdims=True)
        p = p * pl.reciprocal(denom, approx=True)
        o = jnp.dot(p.astype(v.dtype), v, preferred_element_type=jnp.float32)
        o_ref[0, :, h * head_dim:(h + 1) * head_dim] = o.astype(o_ref.dtype)


def attention(q_btd, k_bhsd, v_bhsd, kv_mask, *, num_heads, causal, past_len):
    """q:(B,T,D) in BTD layout; k/v:(B,H,KV,Dh); kv_mask:(B,KV) or None.
    Output stays in (B,T,D) layout (lane-dense HBM stores, no head transposes)."""
    B, T, D = q_btd.shape
    Dh = D // num_heads
    KV = k_bhsd.shape[2]
    has_kv_mask = kv_mask is not None

    in_specs = [
        pl.BlockSpec((1, T, D), lambda b: (b, 0, 0)),
        pl.BlockSpec((1, num_heads, KV, Dh), lambda b: (b, 0, 0, 0)),
        pl.BlockSpec((1, num_heads, KV, Dh), lambda b: (b, 0, 0, 0)),
    ]
    args = [q_btd, k_bhsd, v_bhsd]
    if has_kv_mask:
        in_specs.append(pl.BlockSpec((1, 1, KV), lambda b: (b, 0, 0)))
        args.append(kv_mask.reshape(B, 1, KV).astype(jnp.float32))

    kernel = functools.partial(
        _attention_kernel, num_heads=num_heads, head_dim=Dh, causal=causal,
        past_len=past_len, has_kv_mask=has_kv_mask)
    return pl.pallas_call(
        kernel,
        out_shape=jax.ShapeDtypeStruct((B, T, D), q_btd.dtype),
        grid=(B,),
        in_specs=in_specs,
        out_specs=pl.BlockSpec((1, T, D), lambda b: (b, 0, 0)),
        compiler_params=pltpu.CompilerParams(
            dimension_semantics=("parallel",)),
    )(*args)


# ------------------------------- decoder layer -------------------------------

def decoder_layer(hidden_btd, lp, kv_mask, past4, num_heads, past_len):
    B, T, D = hidden_btd.shape
    Dh = D // num_heads
    scaling = Dh ** -0.5
    past_k, past_v, cross_k, cross_v = past4

    x2 = hidden_btd.reshape(B * T, D)

    # ---- self-attention: pre-LN fused into q/k/v projections ----
    q = ln_matmul(x2, lp["self_attn_ln_g"], lp["self_attn_ln_b"],
                  lp["sa_q_w"], lp["sa_q_b"], scale=scaling)
    k_new = ln_matmul(x2, lp["self_attn_ln_g"], lp["self_attn_ln_b"],
                      lp["sa_k_w"], None)               # Whisper k_proj: no bias
    v_new = ln_matmul(x2, lp["self_attn_ln_g"], lp["self_attn_ln_b"],
                      lp["sa_v_w"], lp["sa_v_b"])

    # Present K/V must be returned as (B, H, P+T, Dh); the concatenated tensor
    # doubles as the attention input (single copy, no duplicate round trip).
    # TODO(synk): small new-K/V reshape+transpose kept in JAX (layout for the
    # required present output); the full history is copied only for `present`.
    k_new_h = k_new.reshape(B, T, num_heads, Dh).transpose(0, 2, 1, 3)
    v_new_h = v_new.reshape(B, T, num_heads, Dh).transpose(0, 2, 1, 3)
    kh = jnp.concatenate([past_k, k_new_h], axis=2)
    vh = jnp.concatenate([past_v, v_new_h], axis=2)

    a = attention(q.reshape(B, T, D), kh, vh, kv_mask,
                  num_heads=num_heads, causal=(T > 1), past_len=past_len)
    hidden1 = matmul_bias_residual(a.reshape(B * T, D),
                                   lp["sa_o_w"], lp["sa_o_b"], x2)

    # ---- cross-attention: cached encoder K/V, no mask, non-causal ----
    q = ln_matmul(hidden1, lp["enc_attn_ln_g"], lp["enc_attn_ln_b"],
                  lp["ca_q_w"], lp["ca_q_b"], scale=scaling)
    a = attention(q.reshape(B, T, D), cross_k, cross_v, None,
                  num_heads=num_heads, causal=False, past_len=0)
    hidden2 = matmul_bias_residual(a.reshape(B * T, D),
                                   lp["ca_o_w"], lp["ca_o_b"], hidden1)

    # ---- FFN: pre-LN + fc1 + exact GELU fused; fc2 + residual fused ----
    h = ln_matmul(hidden2, lp["final_ln_g"], lp["final_ln_b"],
                  lp["fc1_w"], lp["fc1_b"], activation="gelu")
    hidden3 = matmul_bias_residual(h, lp["fc2_w"], lp["fc2_b"], hidden2)

    present = (kh, vh, cross_k, cross_v)
    return hidden3.reshape(B, T, D), present


# -------------------------------- full forward -------------------------------

def whisper_decoder_forward(params, decoder_input_ids, decoder_attention_mask,
                            encoder_last_hidden_state, position_embeds,
                            *past_key_values):
    del encoder_last_hidden_state  # cross K/V are reused from the cache (Whisper)
    emb = params["embed_tokens"]                      # (V, D), tied with lm head
    num_heads = params["num_heads"]
    B, T = decoder_input_ids.shape
    D = emb.shape[1]

    # TODO(synk): embedding gather stays in plain JAX (XLA gather).
    inputs_embeds = jnp.take(emb, decoder_input_ids, axis=0)   # (B, T, D)
    hidden = inputs_embeds + position_embeds

    past_len = past_key_values[0].shape[2]
    kv_mask = decoder_attention_mask                  # (B, T + past_len) or None

    presents = []
    for i, lp in enumerate(params["layers"]):
        past4 = tuple(past_key_values[i * 4 + j] for j in range(4))
        hidden, present = decoder_layer(hidden, lp, kv_mask, past4,
                                        num_heads, past_len)
        presents.append(present)

    # Final LayerNorm fused into the tied-weight lm head; the embedding stays
    # (V, D) and is contracted on D inside the kernel (no emb.T copy), vocab tiled.
    x2 = hidden.reshape(B * T, D)
    logits = ln_matmul(x2, params["final_ln_g"], params["final_ln_b"],
                       emb, None, rhs_contract_last=True)
    return (logits.reshape(B, T, -1), *presents)


# ------------------------------- parameter init -------------------------------

def init_params(key, *, num_layers, vocab, d_model, ffn_dim, num_heads):
    keys = iter(jax.random.split(key, 8 + num_layers * 24))

    def nrm(shape, scale=0.02):
        return scale * jax.random.normal(next(keys), shape, jnp.float32)

    params = {
        "embed_tokens": nrm((vocab, d_model)),
        "final_ln_g": jnp.ones((d_model,), jnp.float32),
        "final_ln_b": jnp.zeros((d_model,), jnp.float32),
        "num_heads": num_heads,
        "layers": [],
    }
    for _ in range(num_layers):
        lp = {
            "self_attn_ln_g": jnp.ones((d_model,), jnp.float32),
            "self_attn_ln_b": jnp.zeros((d_model,), jnp.float32),
            "sa_q_w": nrm((d_model, d_model)), "sa_q_b": nrm((d_model,)),
            "sa_k_w": nrm((d_model, d_model)),
            "sa_v_w": nrm((d_model, d_model)), "sa_v_b": nrm((d_model,)),
            "sa_o_w": nrm((d_model, d_model)), "sa_o_b": nrm((d_model,)),
            "enc_attn_ln_g": jnp.ones((d_model,), jnp.float32),
            "enc_attn_ln_b": jnp.zeros((d_model,), jnp.float32),
            "ca_q_w": nrm((d_model, d_model)), "ca_q_b": nrm((d_model,)),
            "ca_o_w": nrm((d_model, d_model)), "ca_o_b": nrm((d_model,)),
            "final_ln_g": jnp.ones((d_model,), jnp.float32),
            "final_ln_b": jnp.zeros((d_model,), jnp.float32),
            "fc1_w": nrm((d_model, ffn_dim)), "fc1_b": nrm((ffn_dim,)),
            "fc2_w": nrm((ffn_dim, d_model)), "fc2_b": nrm((d_model,)),
        }
        params["layers"].append(lp)
    return params


# ------------------------------------ main ------------------------------------

if __name__ == "__main__":
    B, T, P, S = 2, 8, 8, 16            # batch, query len, past len, encoder len
    D, H, F, V, L = 64, 2, 128, 128, 2  # d_model, heads, ffn, vocab, layers
    Dh = D // H

    root = jax.random.PRNGKey(0)
    k_par, k_ids, k_pos, k_enc, k_kv = jax.random.split(root, 5)

    params = init_params(k_par, num_layers=L, vocab=V, d_model=D,
                         ffn_dim=F, num_heads=H)

    decoder_input_ids = jax.random.randint(k_ids, (B, T), 0, V)
    decoder_attention_mask = jnp.ones((B, T + P), jnp.float32)  # 2-D KV mask
    encoder_last_hidden_state = 0.02 * jax.random.normal(k_enc, (B, S, D), jnp.float32)
    position_embeds = 0.02 * jax.random.normal(k_pos, (T, D), jnp.float32)

    kv_keys = jax.random.split(k_kv, L * 4)
    past_key_values = []
    for i in range(L):
        past_key_values.append(0.02 * jax.random.normal(kv_keys[i * 4 + 0], (B, H, P, Dh)))
        past_key_values.append(0.02 * jax.random.normal(kv_keys[i * 4 + 1], (B, H, P, Dh)))
        past_key_values.append(0.02 * jax.random.normal(kv_keys[i * 4 + 2], (B, H, S, Dh)))
        past_key_values.append(0.02 * jax.random.normal(kv_keys[i * 4 + 3], (B, H, S, Dh)))

    outputs = whisper_decoder_forward(
        params, decoder_input_ids, decoder_attention_mask,
        encoder_last_hidden_state, position_embeds, *past_key_values)

    jax.block_until_ready(outputs)
    lm_logits = outputs[0]
    assert lm_logits.shape == (B, T, V)
    assert outputs[1][0].shape == (B, H, P + T, Dh)
    print("KERNEL_OK")
</pallas_src>

<mosaic_0001>
module attributes {stable_mosaic.version = 11 : i64} {
  func.func @_ln_matmul_kernel(%arg0: i32, %arg1: i32, %arg2: memref<16x64xf32, #tpu.memory_space<vmem>>, %arg3: memref<1x64xf32, #tpu.memory_space<vmem>>, %arg4: memref<1x64xf32, #tpu.memory_space<vmem>>, %arg5: memref<64x64xf32, #tpu.memory_space<vmem>>, %arg6: memref<1x64xf32, #tpu.memory_space<vmem>>, %arg7: memref<16x64xf32, #tpu.memory_space<vmem>>) attributes {dimension_semantics = [#tpu.dimension_semantics<parallel>, #tpu.dimension_semantics<parallel>], iteration_bounds = array<i64: 1, 1>, scalar_prefetch = 0 : i64, scratch_operands = 0 : i64, tpu.core_type = #tpu.core_type<tc>, window_params = [{transform_indices = @transform_0, window_bounds = array<i64: 16, 64>}, {pipeline_mode = #tpu.pipeline_mode<synchronous>, transform_indices = @transform_1, window_bounds = array<i64: 1, 64>}, {pipeline_mode = #tpu.pipeline_mode<synchronous>, transform_indices = @transform_2, window_bounds = array<i64: 1, 64>}, {transform_indices = @transform_3, window_bounds = array<i64: 64, 64>}, {transform_indices = @transform_4, window_bounds = array<i64: 1, 64>}, {transform_indices = @transform_5, window_bounds = array<i64: 16, 64>}]} {
    %c0 = arith.constant 0 : index
    %c0_0 = arith.constant 0 : index
    %0 = vector.load %arg2[%c0, %c0_0] : memref<16x64xf32, #tpu.memory_space<vmem>>, vector<16x64xf32>
    %cst = arith.constant dense<0.000000e+00> : vector<16xf32>
    %1 = vector.multi_reduction <add>, %0, %cst [1] : vector<16x64xf32> to vector<16xf32>
    %2 = vector.shape_cast %1 : vector<16xf32> to vector<16x1xf32>
    %cst_1 = arith.constant 6.400000e+01 : f32
    %3 = vector.broadcast %cst_1 : f32 to vector<16x1xf32>
    %4 = arith.divf %2, %3 : vector<16x1xf32>
    %5 = vector.broadcast %4 : vector<16x1xf32> to vector<16x64xf32>
    %6 = arith.subf %0, %5 : vector<16x64xf32>
    %7 = arith.mulf %6, %6 : vector<16x64xf32>
    %cst_2 = arith.constant dense<0.000000e+00> : vector<16xf32>
    %8 = vector.multi_reduction <add>, %7, %cst_2 [1] : vector<16x64xf32> to vector<16xf32>
    %9 = vector.shape_cast %8 : vector<16xf32> to vector<16x1xf32>
    %cst_3 = arith.constant 6.400000e+01 : f32
    %10 = vector.broadcast %cst_3 : f32 to vector<16x1xf32>
    %11 = arith.divf %9, %10 : vector<16x1xf32>
    %cst_4 = arith.constant 9.99999974E-6 : f32
    %12 = vector.broadcast %cst_4 : f32 to vector<16x1xf32>
    %13 = arith.addf %11, %12 : vector<16x1xf32>
    %14 = math.rsqrt %13 : vector<16x1xf32>
    %15 = vector.broadcast %14 : vector<16x1xf32> to vector<16x64xf32>
    %16 = arith.mulf %6, %15 : vector<16x64xf32>
    %c0_5 = arith.constant 0 : index
    %c0_6 = arith.constant 0 : index
    %17 = vector.load %arg3[%c0_5, %c0_6] : memref<1x64xf32, #tpu.memory_space<vmem>>, vector<1x64xf32>
    %18 = vector.broadcast %17 : vector<1x64xf32> to vector<16x64xf32>
    %19 = arith.mulf %16, %18 : vector<16x64xf32>
    %c0_7 = arith.constant 0 : index
    %c0_8 = arith.constant 0 : index
    %20 = vector.load %arg4[%c0_7, %c0_8] : memref<1x64xf32, #tpu.memory_space<vmem>>, vector<1x64xf32>
    %21 = vector.broadcast %20 : vector<1x64xf32> to vector<16x64xf32>
    %22 = arith.addf %19, %21 : vector<16x64xf32>
    %c0_9 = arith.constant 0 : index
    %c0_10 = arith.constant 0 : index
    %23 = vector.load %arg5[%c0_9, %c0_10] : memref<64x64xf32, #tpu.memory_space<vmem>>, vector<64x64xf32>
    %cst_11 = arith.constant dense<0.000000e+00> : vector<16x64xf32>
    %24 = tpu.matmul %22, %23, %cst_11 {dimension_numbers = #tpu.dot_dimension_numbers<[1], [0], [0], [1], [0, 0, 1, 1], [], []>} : vector<16x64xf32>, vector<64x64xf32>, vector<16x64xf32> -> vector<16x64xf32>
    %c0_12 = arith.constant 0 : index
    %c0_13 = arith.constant 0 : index
    %25 = vector.load %arg6[%c0_12, %c0_13] : memref<1x64xf32, #tpu.memory_space<vmem>>, vector<1x64xf32>
    %26 = vector.broadcast %25 : vector<1x64xf32> to vector<16x64xf32>
    %27 = arith.addf %24, %26 : vector<16x64xf32>
    %cst_14 = arith.constant 0.176776692 : f32
    %28 = vector.broadcast %cst_14 : f32 to vector<16x64xf32>
    %29 = arith.mulf %27, %28 : vector<16x64xf32>
    %c0_15 = arith.constant 0 : index
    %c0_16 = arith.constant 0 : index
    %30 = vector.load %arg7[%c0_15, %c0_16] : memref<16x64xf32, #tpu.memory_space<vmem>>, vector<16x64xf32>
    tpu.vector_store %arg7[%c0_15, %c0_16], %29 {strides = array<i32>} : memref<16x64xf32, #tpu.memory_space<vmem>>, vector<16x64xf32>,
    return
  }
  func.func @transform_0(%arg0: i32, %arg1: i32) -> (i32, i32) {
    %c0_i32 = arith.constant 0 : i32
    %c0_i32_0 = arith.constant 0 : i32
    return %arg0, %c0_i32 : i32, i32
  }
  func.func @transform_1(%arg0: i32, %arg1: i32) -> (i32, i32) {
    %c0_i32 = arith.constant 0 : i32
    %c0_i32_0 = arith.constant 0 : i32
    %c0_i32_1 = arith.constant 0 : i32
    return %c0_i32, %c0_i32_0 : i32, i32
  }
  func.func @transform_2(%arg0: i32, %arg1: i32) -> (i32, i32) {
    %c0_i32 = arith.constant 0 : i32
    %c0_i32_0 = arith.constant 0 : i32
    %c0_i32_1 = arith.constant 0 : i32
    return %c0_i32, %c0_i32_0 : i32, i32
  }
  func.func @transform_3(%arg0: i32, %arg1: i32) -> (i32, i32) {
    %c0_i32 = arith.constant 0 : i32
    %c0_i32_0 = arith.constant 0 : i32
    return %c0_i32, %arg1 : i32, i32
  }
  func.func @transform_4(%arg0: i32, %arg1: i32) -> (i32, i32) {
    %c0_i32 = arith.constant 0 : i32
    %c0_i32_0 = arith.constant 0 : i32
    return %c0_i32, %arg1 : i32, i32
  }
  func.func @transform_5(%arg0: i32, %arg1: i32) -> (i32, i32) {
    %c0_i32 = arith.constant 0 : i32
    return %arg0, %arg1 : i32, i32
  }
}

</mosaic_0001>

<bundles_post_ra>
// kernel: tpu_custom_call.1
= control target key start
LH: loop header
LB: loop body
LE: loop exit
PB: predicated region body
PF: predicated region fallthrough
CT: control target
= control target key end

     0   :  { %10 = vsyncpa [#allocation3], 0  ;;  %s443_s0 = inlined_call_operand.hbm [shape: f32[16,64], index: 0, kind: input, shape index: {}]   ;;  %s444_s1 = inlined_call_operand.vmem [shape: f32[1,64], index: 1, kind: input, shape index: {}]   ;;  %s445_s2 = inlined_call_operand.vmem [shape: f32[1,64], index: 2, kind: input, shape index: {}]   ;;  %s446_s3 = inlined_call_operand.hbm [shape: f32[64,64], index: 3, kind: input, shape index: {}]   ;;  %s447_s4 = inlined_call_operand.vmem [shape: f32[1,64], index: 4, kind: input, shape index: {}]   ;;  %s448_s5 = inlined_call_operand.hbm [shape: f32[16,64], index: 5, kind: output, shape index: {}]  }
   0x1   :  { %11 = vsyncpa [#allocation6], 0 }
   0x2   :  { %12 = vsyncpa [#allocation4], 0  ;;  %s346_s18 = smov [#allocation2]   ;;  %s274_s22 = scalar_lea.hbm %s443_s0, 256 }
   0x3   :  { %s18_s19 = sshll.u32 %s346_s18, 4  ;;  %p275_p0 = scmp.ne.s32.totalorder %s443_s0, %s274_s22  ;;  %s19_s19 = int_to_ptr.vmem [resolvable:$true] %s18_s19 }
   0x4   :  { %p278_p1 = scmp.lt.u32.totalorder %s274_s22, %s443_s0 }
   0x6   :  { %p280_p2 = pnand %p278_p1, %p275_p0 }
   0x8   :  { %283 = shalt.err (!%p280_p2)
}
   0x9   :  { %s284_s27 = scalar_lea.vmem %s19_s19, 256  ;;  %p289_p4 = scmp.lt.s32.totalorder %s19_s19, %s19_s19 }
   0xa   :  { %p285_p3 = scmp.ne.s32.totalorder %s19_s19, %s284_s27  ;;  %p290_p5 = scmp.lt.s32.totalorder %s284_s27, %s284_s27 }
   0xc   :  { %p291_p6 = por %p290_p5, %p289_p4 }
   0xe   :  { %p292_p7 = pnand %p291_p6, %p285_p3 }
  0x10   :  { %295 = shalt.err (!%p292_p7)
}
  0x11   :  { %s347_s28 = smov 128   ;;  %s348_s29 = smov 8  }
  0x12   :  { %24 = dma.hbm_to_vmem [thread:$0]  %s443_s0, 256, %s19_s19, [#allocation3], %s347_s28, %s347_s28, %s348_s29  }
  0x13   :  { %s349_s7 = smov [#allocation5]   ;;  %s296_s11 = scalar_lea.hbm %s446_s3, 1024 }
  0x14   :  { %s34_s8 = sshll.u32 %s349_s7, 4  ;;  %p297_p8 = scmp.ne.s32.totalorder %s446_s3, %s296_s11  ;;  %s35_s8 = int_to_ptr.vmem [resolvable:$true] %s34_s8 }
  0x15   :  { %p300_p9 = scmp.lt.u32.totalorder %s296_s11, %s446_s3 }
  0x17   :  { %p302_p10 = pnand %p300_p9, %p297_p8 }
  0x19   :  { %305 = shalt.err (!%p302_p10)
}
  0x1a   :  { %s306_s16 = scalar_lea.vmem %s35_s8, 1024  ;;  %p311_p12 = scmp.lt.s32.totalorder %s35_s8, %s35_s8 }
  0x1b   :  { %p307_p11 = scmp.ne.s32.totalorder %s35_s8, %s306_s16  ;;  %p312_p13 = scmp.lt.s32.totalorder %s306_s16, %s306_s16 }
  0x1d   :  { %p313_p0 = por %p312_p13, %p311_p12 }
  0x1f   :  { %p314_p1 = pnand %p313_p0, %p307_p11 }
  0x21   :  { %317 = shalt.err (!%p314_p1)
}
  0x22   :  { %40 = dma.hbm_to_vmem [thread:$0]  %s446_s3, 1024, %s35_s8, [#allocation6], %s347_s28, %s347_s28, %s348_s29  }
  0x23   :  { %340 = dma.done.wait [#allocation3], 256  }
  0x24   :  { %341 = vsyncadd [#allocation3], 4294967040 }
  0x25   :  { %342 = dma.done.wait [#allocation6], 1024  }
  0x26   :  { %343 = vsyncadd [#allocation6], 4294966272  ;;  %vm51_vm0 = vcmask 523264   ;;  %v49_v0 = vld [vmem:[#allocation2] sm:$0xff]  ;;  %v50_v1 = vld [vmem:[#allocation2 + $0x8] sm:$0xff] }
  0x27   :  { %v52_v2 = vsel %vm51_vm0, %v49_v0, 0.0  ;;  %v55_v3 = vsel %vm51_vm0, %v50_v1, 0.0  ;;  %v97_v14 = vld [vmem:[#allocation5] sm:$0xff]  ;;  %v98_v15 = vld [vmem:[#allocation5 + $0x8] sm:$0xff]  ;;  %v99_v17 = vld [vmem:[#allocation5 + $0x10] sm:$0xff] }
  0x28   :  { %53 = vadd.xlane.f32.xlu0 %v52_v2  ;;  %v249_v16 = vpack.c.bf16 %v98_v15, %v97_v14  ;;  %v100_v18 = vld [vmem:[#allocation5 + $0x18] sm:$0xff]  ;;  %v101_v19 = vld [vmem:[#allocation5 + $0x20] sm:$0xff]  ;;  %v102_v21 = vld [vmem:[#allocation5 + $0x28] sm:$0xff] }
  0x29   :  { %v253_v20 = vpack.c.bf16 %v100_v18, %v99_v17  ;;  %v257_v22 = vpack.c.bf16 %v102_v21, %v101_v19  ;;  %v103_v23 = vld [vmem:[#allocation5 + $0x30] sm:$0xff]  ;;  %v104_v24 = vld [vmem:[#allocation5 + $0x38] sm:$0xff] }
  0x2a   :  { %250 = vmatprep.subr.bf16.mxu0 %v249_v16  ;;  %v261_v25 = vpack.c.bf16 %v104_v24, %v103_v23  ;;  %v215_v33 = vld [vmem:[%s444_s1] ss:$0 sm:$0xff]  ;;  %s350_s1 = smov [#allocation7]  }
  0x2b   :  { %252 = vmatpush3.bf16.msra.mxu0 %v249_v16  ;;  %v216_v35 = vld [vmem:[%s445_s2] ss:$0 sm:$0xff]  ;;  %s202_s23 = sshll.u32 %s350_s1, 4  ;;  %s203_s23 = int_to_ptr.vmem [resolvable:$true] %s202_s23 }
  0x2c   :  { %56 = vadd.xlane.f32.xlu0 %v55_v3  ;;  %254 = vmatprep.subr.bf16.mxu0 %v253_v20  ;;  %v217_v42 = vld [vmem:[%s447_s4] ss:$0 sm:$0xff]  ;;  %s318_s2 = scalar_lea.vmem %s203_s23, 256  ;;  %p323_p3 = scmp.lt.s32.totalorder %s203_s23, %s203_s23 }
  0x2d   :  { %p319_p2 = scmp.ne.s32.totalorder %s203_s23, %s318_s2  ;;  %p324_p4 = scmp.lt.s32.totalorder %s318_s2, %s318_s2 }
  0x2f   :  { %256 = vmatpush3.bf16.msra.mxu0 %v253_v20  ;;  %p325_p5 = por %p324_p4, %p323_p3 }
  0x30   :  { %258 = vmatprep.subr.bf16.mxu0 %v257_v22 }
  0x31   :  { %p326_p6 = pnand %p325_p5, %p319_p2 }
  0x33   :  { %260 = vmatpush3.bf16.msra.mxu0 %v257_v22 }
  0x34   :  { %262 = vmatprep.subr.bf16.mxu0 %v261_v25 }
  0x37   :  { %264 = vmatpush3.bf16.msra.mxu0 %v261_v25 }
  0xb5   :  { %v54_v4 = vpop.xlane.xlu0 %53 }
  0xb6   :  { %v59_v5 = vmul.f32 0.015625, %v54_v4 }
  0xb8   :  { %v61_v6 = vsub.f32 %v49_v0, %v59_v5 }
  0xb9   :  { %v57_v7 = vpop.xlane.xlu0 %56 }
  0xba   :  { %v60_v8 = vmul.f32 0.015625, %v57_v7  ;;  %v63_v9 = vmul.f32 %v61_v6, %v61_v6 }
  0xbc   :  { %v62_v10 = vsub.f32 %v50_v1, %v60_v8  ;;  %v65_v11 = vsel %vm51_vm0, %v63_v9, 0.0 }
  0xbd   :  { %66 = vadd.xlane.f32.xlu1 %v65_v11 }
  0xbe   :  { %v64_v12 = vmul.f32 %v62_v10, %v62_v10 }
  0xc0   :  { %v68_v13 = vsel %vm51_vm0, %v64_v12, 0.0 }
  0xc1   :  { %69 = vadd.xlane.f32.xlu1 %v68_v13 }
 0x14a   :  { %v67_v26 = vpop.xlane.xlu1 %66 }
 0x14b   :  { %v71_v27 = vmul.f32 0.015625, %v67_v26 }
 0x14d   :  { %v73_v28 = vadd.f32 1e-05, %v71_v27 }
 0x14e   :  { %v70_v29 = vpop.xlane.xlu1 %69 }
 0x14f   :  { %270 = vrsqrt.f32 %v73_v28  ;;  %v72_v30 = vmul.f32 0.015625, %v70_v29 }
 0x151   :  { %v74_v31 = vadd.f32 1e-05, %v72_v30 }
 0x153   :  { %272 = vrsqrt.f32 %v74_v31 }
 0x159   :  { %v271_v32 = vpop.eup %270 }
 0x15a   :  { %v77_v34 = vmul.f32 %v271_v32, %v61_v6 }
 0x15c   :  { %v86_v36 = vmul.f32 %v215_v33, %v77_v34 }
 0x15d   :  { %v273_v37 = vpop.eup %272 }
 0x15e   :  { %v78_v38 = vmul.f32 %v273_v37, %v62_v10  ;;  %v95_v39 = vadd.f32 %v216_v35, %v86_v36 }
 0x160   :  { %v87_v40 = vmul.f32 %v215_v33, %v78_v38  ;;  %246 = vmatprep.mubr.msk.f32.mxu0 %vm51_vm0, %v95_v39 }
 0x162   :  { %v96_v41 = vadd.f32 %v216_v35, %v87_v40 }
 0x164   :  { %247 = vmatmul.mubr.msk.f32.vlgmr.msra.gmra.mrb[0].mxu0 %vm51_vm0, %v96_v41 }
 0x237   :  { %v248_v43 = vpop.f32.mrb[0].mxu0 }
 0x238   :  { %v190_v44 = vadd.f32 %v248_v43, %v217_v42  ;;  %v184_v45 = vpop.f32.mrb[1].mxu0 }
 0x239   :  { %v185_v46 = vadd.f32 %v217_v42, %v184_v45 }
 0x23a   :  { %v194_v47 = vmul.f32 0.17677669, %v190_v44 }
 0x23b   :  { %v193_v48 = vmul.f32 0.17677669, %v185_v46 }
 0x23c   :  { %196 = vst.msk [vmem:[#allocation7 + $0x8] sm:$0xff] %vm51_vm0, %v194_v47 }
 0x23d   :  { %195 = vst.msk [vmem:[#allocation7] sm:$0xff] %vm51_vm0, %v193_v48 }
 0x23e   :  { %329 = shalt.err (!%p326_p6)
}
 0x23f   :  { %s330_s25 = scalar_lea.hbm %s448_s5, 256 }
 0x240   :  { %p331_p7 = scmp.ne.s32.totalorder %s448_s5, %s330_s25  ;;  %p334_p8 = scmp.lt.u32.totalorder %s330_s25, %s448_s5 }
 0x242   :  { %p336_p9 = pnand %p334_p8, %p331_p7 }
 0x244   :  { %339 = shalt.err (!%p336_p9)
}
 0x245   :  { %208 = dma.vmem_to_hbm [thread:$0]  %s203_s23, 256, %s448_s5, [#allocation4], %s347_s28, %s347_s28, %s348_s29  }
 0x246   :  { %344 = dma.done.wait [#allocation4], 256  }
 0x247   :  { %345 = vsyncadd [#allocation4], 4294967040 }
 0x248   :  { %212 = vsyncpa [#allocation3], 1 }
 0x249   :  { %213 = vsyncpa [#allocation6], 1 }
 0x24a   :  { %214 = vsyncpa [#allocation4], 1 }

</bundles_post_ra>
